<compile_context>
chip_gen: v6e
topology: v6e:2x2x1
jax: 0.10.0
libtpu: 0.0.40
codegen_flags: <defaults>
</compile_context>

<pallas_src>
import jax
import jax.numpy as jnp
from jax.experimental import pallas as pl
from jax.experimental.pallas import tpu as pltpu

HIDDEN = 32
_FUSED_M_BYTES = 8 << 20          # use the fused path while dense M (f32) <= 8 MiB


# ---------------------------------------------------------------------------
# Fused small-N kernel: whole problem resident in VMEM, single launch.
# ---------------------------------------------------------------------------
def _fused_kernel(m_ref, b_ref, diag_ref, bmax_ref, mmax_ref,
                  w1_ref, b1_ref, w2_ref, b2_ref, out_ref):
    M = m_ref[...]                                        # (N, N)
    b = b_ref[...]                                        # (N, 1)
    inv_b = pl.reciprocal(bmax_ref[...], approx=False)    # (1, 1)
    inv_m = pl.reciprocal(mmax_ref[...], approx=False)    # (1, 1)

    # x = stack([b, diag], -1); x[:, 0] /= b_max; x[:, 1] /= m_max
    x0 = b * inv_b                                        # (N, 1)
    x1 = diag_ref[...] * inv_m                            # (N, 1)

    # First MLP layer (two K=1 contractions) on the VPU as broadcast outer
    # products -- no MXU systolic pass wasted on K=1 matmuls.
    w1 = w1_ref[...]                                      # (2, H)
    h = x0 * w1[0:1, :] + x1 * w1[1:2, :] + b1_ref[...]   # (N, H)
    h = jnp.maximum(h, 0.0)

    # h_agg = (M / m_max) @ h == (M @ h) * (1/m_max): the scaled copy of M is
    # never materialized (no N^2 divides, no second (N, N) live value).
    h_agg = jnp.dot(M, h, preferred_element_type=jnp.float32) * inv_m
    y_dir = (jnp.dot(h + h_agg, w2_ref[...],
                     preferred_element_type=jnp.float32) + b2_ref[...])  # (N, 1)

    # Epilogue: p = M @ y_dir ; scaler = clamp_min(b.p / ||p||^2, 1e-16).
    p = jnp.dot(M, y_dir, preferred_element_type=jnp.float32)
    p_sq = jnp.sum(p * p)
    bp = jnp.sum(p * b)
    scaler = jnp.maximum(bp / p_sq, 1e-16)
    out_ref[...] = y_dir * scaler


# ---------------------------------------------------------------------------
# Row-tiled large-N path (three small kernels).
# ---------------------------------------------------------------------------
def _first_layer_kernel(b_ref, diag_ref, bmax_ref, mmax_ref, w1_ref, b1_ref,
                        h_ref):
    """h = relu(x @ W1 + b1) for all rows (VPU broadcast outer products)."""
    inv_b = pl.reciprocal(bmax_ref[...], approx=False)
    inv_m = pl.reciprocal(mmax_ref[...], approx=False)
    w1 = w1_ref[...]                                      # (2, H)
    x0 = b_ref[...] * inv_b                               # (N, 1)
    x1 = diag_ref[...] * inv_m                            # (N, 1)
    h = x0 * w1[0:1, :] + x1 * w1[1:2, :] + b1_ref[...]
    h_ref[...] = jnp.maximum(h, 0.0)


def _y_direction_kernel(m_ref, h_ref, mmax_ref, w2_ref, b2_ref, y_ref):
    """One (TM, N) row tile of M -> (TM, 1) tile of y_direction."""
    i = pl.program_id(0)
    tm = y_ref.shape[0]
    inv_m = pl.reciprocal(mmax_ref[...], approx=False)    # (1, 1)
    # (M / m_max) @ h == (M @ h) * (1/m_max): only the (TM, H) result is scaled.
    h_agg = jnp.dot(m_ref[...], h_ref[...],
                    preferred_element_type=jnp.float32) * inv_m      # (TM, H)
    row0 = pl.multiple_of(i * tm, 8)
    h_tile = h_ref[pl.ds(row0, tm), :]                    # (TM, H)
    y_ref[...] = (jnp.dot(h_tile + h_agg, w2_ref[...],
                          preferred_element_type=jnp.float32) + b2_ref[...])


def _p_direction_kernel(m_ref, y_ref, p_ref):
    """One (TM, N) row tile of M -> (TM, 1) tile of p = M @ y_direction."""
    p_ref[...] = jnp.dot(m_ref[...], y_ref[...],
                         preferred_element_type=jnp.float32)


# ---------------------------------------------------------------------------
# Helpers.
# ---------------------------------------------------------------------------
def _choose_row_tile(n):
    """Row tile TM for the (TM, N) f32 blocks of M: keep the double-buffered
    tile within ~16 MiB so it fits v5e's scoped default and v7x's 64 MiB
    physical VMEM; prefer 256 (multiple of both 128- and 256-wide MXUs)."""
    if n <= 512:
        return n
    cap = max(8, (16 << 20) // (2 * 4 * n))   # 2 buffers * 4 bytes/elem
    tm = min(n, 256, cap)
    tm -= tm % 8
    tm = max(tm, 8)
    while n % tm and tm > 8:
        tm -= 8
    return tm if n % tm == 0 else n


def _vmem_limit(*nbytes):
    total = sum(int(x) for x in nbytes) + (4 << 20)
    return int(min(48 << 20, max(32 << 20, total)))


# ---------------------------------------------------------------------------
# Wrapper mirroring SingleInference.forward for the concrete model.
# ---------------------------------------------------------------------------
def single_inference(b, m_indices, m_values, params, *,
                     force_tiled=False, row_tile=None):
    w1, b1, w2, b2 = params
    n = b.shape[0]
    rows, cols = m_indices[0], m_indices[1]
    b32 = b.astype(jnp.float32)
    vals = m_values.astype(jnp.float32)

    # TODO(synk): the data-dependent COO scatter (sparse densification) has no
    # clean Pallas TPU equivalent; longer term a scalar-prefetched ELL/SpMV
    # kernel (column indices in SMEM) would skip the dense N^2 matrix entirely.
    m_dense = jnp.zeros((n, n), jnp.float32).at[rows, cols].add(vals)

    # Diagonal straight from the COO values (O(nnz)), exactly like the torch
    # module; assumes unique COO coordinates (as the torch path effectively does).
    diag = jnp.zeros((n,), jnp.float32).at[rows].add(
        jnp.where(rows == cols, vals, 0.0))

    b_col = b32.reshape(n, 1)
    diag_col = diag.reshape(n, 1)
    b_max = jnp.max(jnp.abs(b32)).reshape(1, 1)           # ||b||_inf
    m_max = jnp.max(jnp.abs(vals)).reshape(1, 1)          # ||m_values||_inf

    # ---- fused small-N path ------------------------------------------------
    if not force_tiled and n * n * 4 <= _FUSED_M_BYTES:
        out = pl.pallas_call(
            _fused_kernel,
            out_shape=jax.ShapeDtypeStruct((n, 1), jnp.float32),
            compiler_params=pltpu.CompilerParams(
                vmem_limit_bytes=_vmem_limit(n * n * 4, 4 * n * (HIDDEN + 4))),
        )(m_dense, b_col, diag_col, b_max, m_max, w1, b1, w2, b2)
        return out[:, 0]

    # ---- row-tiled large-N path ---------------------------------------------
    tm = int(row_tile) if row_tile is not None else _choose_row_tile(n)
    assert n % tm == 0, "row_tile must divide n"
    grid = (n // tm,)

    # First MLP layer, computed once for all row tiles (tiny preceding call).
    h = pl.pallas_call(
        _first_layer_kernel,
        out_shape=jax.ShapeDtypeStruct((n, HIDDEN), jnp.float32),
    )(b_col, diag_col, b_max, m_max, w1, b1)

    # y_direction: first streamed pass over the rows of M.
    y_dir = pl.pallas_call(
        _y_direction_kernel,
        out_shape=jax.ShapeDtypeStruct((n, 1), jnp.float32),
        grid=grid,
        in_specs=[
            pl.BlockSpec((tm, n), lambda i: (i, 0)),       # M row tile
            pl.BlockSpec((n, HIDDEN), lambda i: (0, 0)),   # full h (small)
            pl.BlockSpec((1, 1), lambda i: (0, 0)),        # m_max
            pl.BlockSpec((HIDDEN, 1), lambda i: (0, 0)),   # w2
            pl.BlockSpec((1, 1), lambda i: (0, 0)),        # b2
        ],
        out_specs=pl.BlockSpec((tm, 1), lambda i: (i, 0)),
        compiler_params=pltpu.CompilerParams(
            dimension_semantics=("parallel",),
            vmem_limit_bytes=_vmem_limit(2 * tm * n * 4, 2 * n * HIDDEN * 4)),
    )(m_dense, h, m_max, w2, b2)

    # p = M @ y_direction: second streamed pass over the rows of M.
    p = pl.pallas_call(
        _p_direction_kernel,
        out_shape=jax.ShapeDtypeStruct((n, 1), jnp.float32),
        grid=grid,
        in_specs=[
            pl.BlockSpec((tm, n), lambda i: (i, 0)),       # M row tile
            pl.BlockSpec((n, 1), lambda i: (0, 0)),        # full y_direction
        ],
        out_specs=pl.BlockSpec((tm, 1), lambda i: (i, 0)),
        compiler_params=pltpu.CompilerParams(
            dimension_semantics=("parallel",),
            vmem_limit_bytes=_vmem_limit(2 * tm * n * 4, 8 * n * 4)),
    )(m_dense, y_dir)

    # O(N) scalar epilogue in plain JAX (negligible; per review feedback).
    y_flat = y_dir[:, 0]
    p_flat = p[:, 0]
    p_sq = jnp.sum(p_flat * p_flat)
    bp = jnp.dot(p_flat, b32)
    scaler = jnp.maximum(bp / p_sq, jnp.float32(1e-16))
    return y_flat * scaler


# ---------------------------------------------------------------------------
# Pure-JAX reference with identical semantics (for self-check).
# ---------------------------------------------------------------------------
def reference(b, m_indices, m_values, params):
    w1, b1, w2, b2 = params
    n = b.shape[0]
    rows, cols = m_indices[0], m_indices[1]
    vals = m_values.astype(jnp.float32)
    M = jnp.zeros((n, n), jnp.float32).at[rows, cols].add(vals)
    diag = jnp.zeros((n,), jnp.float32).at[rows].add(
        jnp.where(rows == cols, vals, 0.0))
    b_max = jnp.max(jnp.abs(b))
    m_max = jnp.max(jnp.abs(vals))
    x0 = b / b_max
    x1 = diag / m_max
    h = jnp.maximum(x0[:, None] * w1[0:1] + x1[:, None] * w1[1:2] + b1, 0.0)
    h_agg = (M @ h) / m_max
    y_dir = ((h + h_agg) @ w2 + b2)[:, 0]
    p = M @ y_dir
    scaler = jnp.maximum(jnp.dot(p, b) / jnp.sum(p * p), 1e-16)
    return y_dir * scaler


if __name__ == "__main__":
    key = jax.random.PRNGKey(0)
    n = 128
    k_b, k_diag, k_off, k_w1, k_b1, k_w2, k_b2 = jax.random.split(key, 7)

    # Sparse COO matrix: full diagonal + two off-diagonal bands (unique coords).
    i = jnp.arange(n, dtype=jnp.int32)
    rows = jnp.concatenate([i, i, i])
    cols = jnp.concatenate([i, (i + 1) % n, (i + 3) % n])
    m_indices = jnp.stack([rows, cols])                       # (2, 3n) int32
    diag_vals = jax.random.uniform(k_diag, (n,), minval=1.0, maxval=2.0)
    off_vals = 0.1 * jax.random.normal(k_off, (2 * n,))
    m_values = jnp.concatenate([diag_vals, off_vals]).astype(jnp.float32)

    b = jax.random.normal(k_b, (n,), dtype=jnp.float32)

    # Deterministic synthetic model parameters.
    w1 = (0.5 * jax.random.normal(k_w1, (2, HIDDEN))).astype(jnp.float32)
    b1 = (0.1 * jax.random.normal(k_b1, (1, HIDDEN))).astype(jnp.float32)
    w2 = (0.5 * jax.random.normal(k_w2, (HIDDEN, 1))).astype(jnp.float32)
    b2 = (0.1 * jax.random.normal(k_b2, (1, 1))).astype(jnp.float32)
    params = (w1, b1, w2, b2)

    y_ref = reference(b, m_indices, m_values, params)

    # Fused small-N path (default at n=128).
    y_fused = jax.block_until_ready(
        single_inference(b, m_indices, m_values, params))
    assert y_fused.shape == (n,)
    assert jnp.allclose(y_fused, y_ref, rtol=1e-4, atol=1e-5), \
        "fused kernel / reference mismatch"

    # Row-tiled large-N path, forced at a small tile so the grid>1 code runs.
    y_tiled = jax.block_until_ready(
        single_inference(b, m_indices, m_values, params,
                         force_tiled=True, row_tile=64))
    assert y_tiled.shape == (n,)
    assert jnp.allclose(y_tiled, y_ref, rtol=1e-4, atol=1e-5), \
        "tiled kernel / reference mismatch"

    print("KERNEL_OK")
</pallas_src>

<mosaic_0001>
module attributes {stable_mosaic.version = 11 : i64} {
  func.func @_fused_kernel(%arg0: memref<128x128xf32, #tpu.memory_space<vmem>>, %arg1: memref<128x1xf32, #tpu.memory_space<vmem>>, %arg2: memref<128x1xf32, #tpu.memory_space<vmem>>, %arg3: memref<1x1xf32, #tpu.memory_space<vmem>>, %arg4: memref<1x1xf32, #tpu.memory_space<vmem>>, %arg5: memref<2x32xf32, #tpu.memory_space<vmem>>, %arg6: memref<1x32xf32, #tpu.memory_space<vmem>>, %arg7: memref<32x1xf32, #tpu.memory_space<vmem>>, %arg8: memref<1x1xf32, #tpu.memory_space<vmem>>, %arg9: memref<128x1xf32, #tpu.memory_space<vmem>>) attributes {dimension_semantics = [], scalar_prefetch = 0 : i64, scratch_operands = 0 : i64, tpu.core_type = #tpu.core_type<tc>} {
    %c0 = arith.constant 0 : index
    %c0_0 = arith.constant 0 : index
    %0 = vector.load %arg0[%c0, %c0_0] : memref<128x128xf32, #tpu.memory_space<vmem>>, vector<128x128xf32>
    %c0_1 = arith.constant 0 : index
    %c0_2 = arith.constant 0 : index
    %1 = vector.load %arg1[%c0_1, %c0_2] : memref<128x1xf32, #tpu.memory_space<vmem>>, vector<128x1xf32>
    %c0_3 = arith.constant 0 : index
    %c0_4 = arith.constant 0 : index
    %2 = vector.load %arg3[%c0_3, %c0_4] : memref<1x1xf32, #tpu.memory_space<vmem>>, vector<1x1xf32>
    %3 = tpu.reciprocal %2 : vector<1x1xf32> -> vector<1x1xf32>
    %c0_5 = arith.constant 0 : index
    %c0_6 = arith.constant 0 : index
    %4 = vector.load %arg4[%c0_5, %c0_6] : memref<1x1xf32, #tpu.memory_space<vmem>>, vector<1x1xf32>
    %5 = tpu.reciprocal %4 : vector<1x1xf32> -> vector<1x1xf32>
    %6 = vector.broadcast %3 : vector<1x1xf32> to vector<128x1xf32>
    %7 = arith.mulf %1, %6 : vector<128x1xf32>
    %c0_7 = arith.constant 0 : index
    %c0_8 = arith.constant 0 : index
    %8 = vector.load %arg2[%c0_7, %c0_8] : memref<128x1xf32, #tpu.memory_space<vmem>>, vector<128x1xf32>
    %9 = vector.broadcast %5 : vector<1x1xf32> to vector<128x1xf32>
    %10 = arith.mulf %8, %9 : vector<128x1xf32>
    %c0_9 = arith.constant 0 : index
    %c0_10 = arith.constant 0 : index
    %11 = vector.load %arg5[%c0_9, %c0_10] : memref<2x32xf32, #tpu.memory_space<vmem>>, vector<2x32xf32>
    %12 = vector.extract_strided_slice %11 {offsets = [0, 0], sizes = [1, 32], strides = [1, 1]} : vector<2x32xf32> to vector<1x32xf32>
    %13 = vector.broadcast %7 : vector<128x1xf32> to vector<128x32xf32>
    %14 = vector.broadcast %12 : vector<1x32xf32> to vector<128x32xf32>
    %15 = arith.mulf %13, %14 : vector<128x32xf32>
    %16 = vector.extract_strided_slice %11 {offsets = [1, 0], sizes = [1, 32], strides = [1, 1]} : vector<2x32xf32> to vector<1x32xf32>
    %17 = vector.broadcast %10 : vector<128x1xf32> to vector<128x32xf32>
    %18 = vector.broadcast %16 : vector<1x32xf32> to vector<128x32xf32>
    %19 = arith.mulf %17, %18 : vector<128x32xf32>
    %20 = arith.addf %15, %19 : vector<128x32xf32>
    %c0_11 = arith.constant 0 : index
    %c0_12 = arith.constant 0 : index
    %21 = vector.load %arg6[%c0_11, %c0_12] : memref<1x32xf32, #tpu.memory_space<vmem>>, vector<1x32xf32>
    %22 = vector.broadcast %21 : vector<1x32xf32> to vector<128x32xf32>
    %23 = arith.addf %20, %22 : vector<128x32xf32>
    %cst = arith.constant 0.000000e+00 : f32
    %24 = vector.broadcast %cst : f32 to vector<128x32xf32>
    %25 = arith.maximumf %23, %24 : vector<128x32xf32>
    %cst_13 = arith.constant dense<0.000000e+00> : vector<128x32xf32>
    %26 = tpu.matmul %0, %25, %cst_13 {dimension_numbers = #tpu.dot_dimension_numbers<[1], [0], [0], [1], [0, 0, 1, 1], [], []>} : vector<128x128xf32>, vector<128x32xf32>, vector<128x32xf32> -> vector<128x32xf32>
    %27 = vector.broadcast %5 : vector<1x1xf32> to vector<128x32xf32>
    %28 = arith.mulf %26, %27 : vector<128x32xf32>
    %29 = arith.addf %25, %28 : vector<128x32xf32>
    %c0_14 = arith.constant 0 : index
    %c0_15 = arith.constant 0 : index
    %30 = vector.load %arg7[%c0_14, %c0_15] : memref<32x1xf32, #tpu.memory_space<vmem>>, vector<32x1xf32>
    %cst_16 = arith.constant dense<0.000000e+00> : vector<128x1xf32>
    %31 = tpu.matmul %29, %30, %cst_16 {dimension_numbers = #tpu.dot_dimension_numbers<[1], [0], [0], [1], [0, 0, 1, 1], [], []>} : vector<128x32xf32>, vector<32x1xf32>, vector<128x1xf32> -> vector<128x1xf32>
    %c0_17 = arith.constant 0 : index
    %c0_18 = arith.constant 0 : index
    %32 = vector.load %arg8[%c0_17, %c0_18] : memref<1x1xf32, #tpu.memory_space<vmem>>, vector<1x1xf32>
    %33 = vector.broadcast %32 : vector<1x1xf32> to vector<128x1xf32>
    %34 = arith.addf %31, %33 : vector<128x1xf32>
    %cst_19 = arith.constant dense<0.000000e+00> : vector<128x1xf32>
    %35 = tpu.matmul %0, %34, %cst_19 {dimension_numbers = #tpu.dot_dimension_numbers<[1], [0], [0], [1], [0, 0, 1, 1], [], []>} : vector<128x128xf32>, vector<128x1xf32>, vector<128x1xf32> -> vector<128x1xf32>
    %36 = arith.mulf %35, %35 : vector<128x1xf32>
    %37 = vector.shape_cast %36 : vector<128x1xf32> to vector<1x128x1xf32>
    %cst_20 = arith.constant dense<0.000000e+00> : vector<1xf32>
    %38 = vector.multi_reduction <add>, %37, %cst_20 [1, 2] : vector<1x128x1xf32> to vector<1xf32>
    %39 = vector.shape_cast %38 : vector<1xf32> to vector<1x1x1xf32>
    %40 = vector.extract %39[0, 0, 0] : f32 from vector<1x1x1xf32>
    %41 = arith.mulf %35, %1 : vector<128x1xf32>
    %42 = vector.shape_cast %41 : vector<128x1xf32> to vector<1x128x1xf32>
    %cst_21 = arith.constant dense<0.000000e+00> : vector<1xf32>
    %43 = vector.multi_reduction <add>, %42, %cst_21 [1, 2] : vector<1x128x1xf32> to vector<1xf32>
    %44 = vector.shape_cast %43 : vector<1xf32> to vector<1x1x1xf32>
    %45 = vector.extract %44[0, 0, 0] : f32 from vector<1x1x1xf32>
    %46 = arith.divf %45, %40 : f32
    %cst_22 = arith.constant 1.000000e-16 : f32
    %47 = arith.maximumf %46, %cst_22 : f32
    %48 = vector.broadcast %47 : f32 to vector<128x1xf32>
    %49 = arith.mulf %34, %48 : vector<128x1xf32>
    %c0_23 = arith.constant 0 : index
    %c0_24 = arith.constant 0 : index
    %50 = vector.load %arg9[%c0_23, %c0_24] : memref<128x1xf32, #tpu.memory_space<vmem>>, vector<128x1xf32>
    tpu.vector_store %arg9[%c0_23, %c0_24], %49 {strides = array<i32>} : memref<128x1xf32, #tpu.memory_space<vmem>>, vector<128x1xf32>,
    return
  }
}

</mosaic_0001>

<bundles_post_ra>
// kernel: tpu_custom_call.1
= control target key start
LH: loop header
LB: loop body
LE: loop exit
PB: predicated region body
PF: predicated region fallthrough
CT: control target
= control target key end

     0   :  { %v1376_v0 = vmov 0   ;;  %v75_v5 = vlaneseq  ;;  %vm582_vm0 = vcmask 261120   ;;  %vm937_vm1 = vcmask 7168   ;;  %s2148_s3 = inlined_call_operand.<no memory space> [shape: f32[1,1], index: 3, kind: input, shape index: {}]   ;;  %s2149_s4 = inlined_call_operand.<no memory space> [shape: f32[1,1], index: 4, kind: input, shape index: {}]   ;;  %s2150_s1 = inlined_call_operand.vmem [shape: f32[128,1], index: 1, kind: input, shape index: {}]   ;;  %s2151_s2 = inlined_call_operand.vmem [shape: f32[128,1], index: 2, kind: input, shape index: {}]   ;;  %s2152_s0 = inlined_call_operand.vmem [shape: f32[128,128], index: 0, kind: input, shape index: {}]   ;;  %s2153_s5 = inlined_call_operand.vmem [shape: f32[2,32], index: 5, kind: input, shape index: {}]   ;;  %s2154_s6 = inlined_call_operand.vmem [shape: f32[1,32], index: 6, kind: input, shape index: {}]   ;;  %s2155_s7 = inlined_call_operand.vmem [shape: f32[32,1], index: 7, kind: input, shape index: {}]   ;;  %s2156_s8 = inlined_call_operand.<no memory space> [shape: f32[1,1], index: 8, kind: input, shape index: {}]   ;;  %s2157_s9 = inlined_call_operand.vmem [shape: f32[128,1], index: 9, kind: output, shape index: {}]  }
   0x1   :  { %1363 = vset.pattern.permute.xlu1 %v1376_v0  ;;  %1362 = vset.pattern.permute.xlu0 %v1376_v0  ;;  %v14_v1 = vstv %s2148_s3  ;;  %v16_v2 = vstv %s2149_s4  ;;  %v69_v9 = vld [vmem:[%s2150_s1 + $0x78] sm:$0xff]  ;;  %v68_v10 = vld [vmem:[%s2150_s1 + $0x70] sm:$0xff] }
   0x2   :  { %15 = vst [vmem:[#allocation2] sm:$0x1] %v14_v1  ;;  %17 = vst [vmem:[#allocation3] sm:$0x1] %v16_v2  ;;  %v1434_v6 = vshrl.u32 %v75_v5, 7  ;;  %v111_v14 = vld [vmem:[%s2151_s2 + $0x78] sm:$0xff] }
   0x3   :  { %v110_v15 = vld [vmem:[%s2151_s2 + $0x70] sm:$0xff]  ;;  %v109_v20 = vld [vmem:[%s2151_s2 + $0x68] sm:$0xff]  ;;  %v108_v24 = vld [vmem:[%s2151_s2 + $0x60] sm:$0xff] }
   0x4   :  { %v1437_v7 = vsub.s32 0, %v1434_v6  ;;  %v67_v21 = vld [vmem:[%s2150_s1 + $0x68] sm:$0xff]  ;;  %v66_v25 = vld [vmem:[%s2150_s1 + $0x60] sm:$0xff]  ;;  %v107_v28 = vld [vmem:[%s2151_s2 + $0x58] sm:$0xff] }
   0x5   :  { %v65_v29 = vld [vmem:[%s2150_s1 + $0x58] sm:$0xff]  ;;  %v106_v32 = vld [vmem:[%s2151_s2 + $0x50] sm:$0xff]  ;;  %v105_v36 = vld [vmem:[%s2151_s2 + $0x48] sm:$0xff] }
   0x6   :  { %v64_v33 = vld [vmem:[%s2150_s1 + $0x50] sm:$0xff]  ;;  %v1499_v37 = vld [vmem:[%s2150_s1 + $0x48] sm:$0xff]  ;;  %v104_v40 = vld [vmem:[%s2151_s2 + $0x40] sm:$0xff] }
   0x7   :  { %v1510_v41 = vld [vmem:[%s2150_s1 + $0x40] sm:$0xff]  ;;  %v103_v44 = vld [vmem:[%s2151_s2 + $0x38] sm:$0xff]  ;;  %v102_v48 = vld [vmem:[%s2151_s2 + $0x30] sm:$0xff] }
   0x8   :  { %v1521_v45 = vld [vmem:[%s2150_s1 + $0x38] sm:$0xff]  ;;  %v1532_v49 = vld [vmem:[%s2150_s1 + $0x30] sm:$0xff]  ;;  %v101_v52 = vld [vmem:[%s2151_s2 + $0x28] sm:$0xff] }
   0x9   :  { %v70_v3 = vld [vmem:[#allocation2] sm:$0x1]  ;;  %v72_v4 = vld [vmem:[#allocation3] sm:$0x1]  ;;  %v1543_v53 = vld [vmem:[%s2150_s1 + $0x28] sm:$0xff] }
   0xa   :  { %1364 = vrcp.f32 %v70_v3  ;;  %v100_v56 = vld [vmem:[%s2151_s2 + $0x20] sm:$0xff]  ;;  %v99_v60 = vld [vmem:[%s2151_s2 + $0x18] sm:$0xff]  ;;  %v98_v0 = vld [vmem:[%s2151_s2 + $0x10] sm:$0xff] }
   0xb   :  { %1366 = vrcp.f32 %v72_v4  ;;  %v1554_v57 = vld [vmem:[%s2150_s1 + $0x20] sm:$0xff]  ;;  %v1565_v61 = vld [vmem:[%s2150_s1 + $0x18] sm:$0xff]  ;;  %v1576_v1 = vld [vmem:[%s2150_s1 + $0x10] sm:$0xff] }
   0xc   :  { %v97_v4 = vld [vmem:[%s2151_s2 + $0x8] sm:$0xff] }
   0xd   :  { %v1587_v5 = vld [vmem:[%s2150_s1 + $0x8] sm:$0xff] }
  0x17   :  { %v1365_v8 = vpop.eup %1364 }
  0x18   :  { %v1367_v11 = vpop.eup %1366  ;;  %v1446_v12 = vrot.slane %v1365_v8, %v1437_v7 }
  0x19   :  { %v1449_v13 = vrot.slane %v1367_v11, %v1437_v7  ;;  %v1598_v11 = vld [vmem:[%s2150_s1] sm:$0xff] }
  0x1a   :  { %v95_v16 = vmul.f32 %v1446_v12, %v69_v9  ;;  %v94_v17 = vmul.f32 %v1446_v12, %v68_v10  ;;  %v93_v23 = vmul.f32 %v1446_v12, %v67_v21  ;;  %v92_v27 = vmul.f32 %v1446_v12, %v66_v25  ;;  %v96_v10 = vld [vmem:[%s2151_s2] sm:$0xff] }
  0x1b   :  { %v133_v18 = vmul.f32 %v1449_v13, %v111_v14  ;;  %v132_v19 = vmul.f32 %v1449_v13, %v110_v15  ;;  %v131_v22 = vmul.f32 %v1449_v13, %v109_v20  ;;  %v130_v26 = vmul.f32 %v1449_v13, %v108_v24 }
  0x1c   :  { %212 = vperm.xlu0 %1362, %v95_v16   ;;  %207 = vperm.xlu1 %1363, %v94_v17   ;;  %v129_v30 = vmul.f32 %v1449_v13, %v107_v28  ;;  %v91_v31 = vmul.f32 %v1446_v12, %v65_v29  ;;  %v128_v34 = vmul.f32 %v1449_v13, %v106_v32  ;;  %v1607_v16 = vld [vmem:[%s2152_s0] sm:$0xff]  ;;  %v317_v17 = vsub.s32 1, %v1434_v6 }
  0x1d   :  { %v90_v35 = vmul.f32 %v1446_v12, %v64_v33  ;;  %v127_v38 = vmul.f32 %v1449_v13, %v105_v36  ;;  %v89_v39 = vmul.f32 %v1446_v12, %v1499_v37  ;;  %v126_v42 = vmul.f32 %v1449_v13, %v104_v40  ;;  %1210 = vmatprep.mubr.f32.mxu0 %v1607_v16 }
  0x1e   :  { %v88_v43 = vmul.f32 %v1446_v12, %v1510_v41  ;;  %v125_v46 = vmul.f32 %v1449_v13, %v103_v44  ;;  %v87_v47 = vmul.f32 %v1446_v12, %v1521_v45  ;;  %v124_v50 = vmul.f32 %v1449_v13, %v102_v48 }
  0x1f   :  { %v86_v51 = vmul.f32 %v1446_v12, %v1532_v49  ;;  %v123_v54 = vmul.f32 %v1449_v13, %v101_v52  ;;  %v85_v55 = vmul.f32 %v1446_v12, %v1543_v53  ;;  %v122_v58 = vmul.f32 %v1449_v13, %v100_v56 }
  0x20   :  { %312 = vperm.xlu0 %1362, %v133_v18   ;;  %307 = vperm.xlu1 %1363, %v132_v19   ;;  %v84_v59 = vmul.f32 %v1446_v12, %v1554_v57  ;;  %v121_v62 = vmul.f32 %v1449_v13, %v99_v60  ;;  %v83_v63 = vmul.f32 %v1446_v12, %v1565_v61  ;;  %v134_v18 = vld [vmem:[%s2153_s5] sm:$0x3]  ;;  %s1377_s5 = smov 1e-16  }
  0x21   :  { %v120_v2 = vmul.f32 %v1449_v13, %v98_v0  ;;  %v82_v3 = vmul.f32 %v1446_v12, %v1576_v1  ;;  %v119_v8 = vmul.f32 %v1449_v13, %v97_v4  ;;  %v81_v9 = vmul.f32 %v1446_v12, %v1587_v5 }
  0x22   :  { %v118_v14 = vmul.f32 %v1449_v13, %v96_v10  ;;  %v80_v15 = vmul.f32 %v1446_v12, %v1598_v11  ;;  %v1615_v12 = vrot.slane %v134_v18, %v1437_v7  ;;  %v1617_v21 = vrot.slane %v134_v18, %v317_v17 }
  0x24   :  { %302 = vperm.xlu1 %1363, %v131_v22   ;;  %202 = vperm.xlu0 %1362, %v93_v23  }
  0x28   :  { %297 = vperm.xlu1 %1363, %v130_v26   ;;  %197 = vperm.xlu0 %1362, %v92_v27   ;;  %v1626_v26 = vld [vmem:[%s2154_s6] ss:$0 sm:$0xff] }
  0x2c   :  { %292 = vperm.xlu1 %1363, %v129_v30   ;;  %192 = vperm.xlu0 %1362, %v91_v31  }
  0x30   :  { %287 = vperm.xlu1 %1363, %v128_v34   ;;  %187 = vperm.xlu0 %1362, %v90_v35  }
  0x34   :  { %282 = vperm.xlu1 %1363, %v127_v38   ;;  %182 = vperm.xlu0 %1362, %v89_v39  }
  0x38   :  { %277 = vperm.xlu1 %1363, %v126_v42   ;;  %177 = vperm.xlu0 %1362, %v88_v43  }
  0x3c   :  { %272 = vperm.xlu1 %1363, %v125_v46   ;;  %172 = vperm.xlu0 %1362, %v87_v47  }
  0x40   :  { %267 = vperm.xlu1 %1363, %v124_v50   ;;  %167 = vperm.xlu0 %1362, %v86_v51  }
  0x44   :  { %262 = vperm.xlu1 %1363, %v123_v54   ;;  %162 = vperm.xlu0 %1362, %v85_v55  }
  0x48   :  { %257 = vperm.xlu1 %1363, %v122_v58   ;;  %157 = vperm.xlu0 %1362, %v84_v59  }
  0x4c   :  { %252 = vperm.xlu1 %1363, %v121_v62   ;;  %152 = vperm.xlu0 %1362, %v83_v63  }
  0x50   :  { %247 = vperm.xlu1 %1363, %v120_v2   ;;  %147 = vperm.xlu0 %1362, %v82_v3  }
  0x54   :  { %242 = vperm.xlu1 %1363, %v119_v8   ;;  %142 = vperm.xlu0 %1362, %v81_v9  }
  0x58   :  { %237 = vperm.xlu1 %1363, %v118_v14   ;;  %137 = vperm.xlu0 %1362, %v80_v15  }
  0x5c   :  { %536 = vperm.xlu0 %1362, %v1449_v13  }
  0x97   :  { %v213_v19 = vpop.permute.xlu0 %212  ;;  %v208_v20 = vpop.permute.xlu1 %207 }
  0x98   :  { %v234_v23 = vmul.f32 %v1615_v12, %v213_v19  ;;  %v233_v24 = vmul.f32 %v1615_v12, %v208_v20 }
  0x9b   :  { %v313_v13 = vpop.permute.xlu0 %312  ;;  %v308_v22 = vpop.permute.xlu1 %307 }
  0x9c   :  { %v334_v25 = vmul.f32 %v1617_v21, %v313_v13  ;;  %v333_v6 = vmul.f32 %v1617_v21, %v308_v22 }
  0x9e   :  { %v350_v27 = vadd.f32 %v334_v25, %v234_v23  ;;  %v349_v7 = vadd.f32 %v333_v6, %v233_v24 }
  0x9f   :  { %v303_v28 = vpop.permute.xlu1 %302  ;;  %v203_v29 = vpop.permute.xlu0 %202 }
  0xa0   :  { %v332_v30 = vmul.f32 %v1617_v21, %v303_v28  ;;  %v232_v31 = vmul.f32 %v1615_v12, %v203_v29  ;;  %v373_v32 = vadd.f32 %v1626_v26, %v350_v27  ;;  %v372_v33 = vadd.f32 %v1626_v26, %v349_v7 }
  0xa2   :  { %v348_v34 = vadd.f32 %v332_v30, %v232_v31  ;;  %v1632_v35 = vmax.f32 %v373_v32, 0.0  ;;  %v1637_v42 = vmax.f32 %v372_v33, 0.0 }
  0xa3   :  { %v298_v36 = vpop.permute.xlu1 %297  ;;  %v198_v38 = vpop.permute.xlu0 %197 }
  0xa4   :  { %v331_v39 = vmul.f32 %v1617_v21, %v298_v36  ;;  %v231_v40 = vmul.f32 %v1615_v12, %v198_v38  ;;  %1178 = vmatprep.subr.mxu0 %v1632_v35  ;;  %v371_v43 = vadd.f32 %v1626_v26, %v348_v34 }
  0xa5   :  { %1179 = vmatpush3.msra.mxu0 %v1632_v35 }
  0xa6   :  { %v347_v44 = vadd.f32 %v331_v39, %v231_v40  ;;  %1180 = vmatprep.subr.mxu0 %v1637_v42  ;;  %v1642_v46 = vmax.f32 %v371_v43, 0.0 }
  0xa7   :  { %1181 = vmatpush3.msra.mxu0 %v1637_v42  ;;  %v293_v47 = vpop.permute.xlu1 %292  ;;  %v193_v48 = vpop.permute.xlu0 %192 }
  0xa8   :  { %v330_v50 = vmul.f32 %v1617_v21, %v293_v47  ;;  %v230_v51 = vmul.f32 %v1615_v12, %v193_v48  ;;  %1182 = vmatprep.subr.mxu0 %v1642_v46  ;;  %v370_v52 = vadd.f32 %v1626_v26, %v347_v44 }
  0xa9   :  { %1183 = vmatpush3.msra.mxu0 %v1642_v46 }
  0xaa   :  { %v346_v54 = vadd.f32 %v330_v50, %v230_v51  ;;  %v1650_v55 = vmax.f32 %v370_v52, 0.0 }
  0xab   :  { %v288_v56 = vpop.permute.xlu1 %287  ;;  %v188_v58 = vpop.permute.xlu0 %187 }
  0xac   :  { %v329_v59 = vmul.f32 %v1617_v21, %v288_v56  ;;  %v229_v60 = vmul.f32 %v1615_v12, %v188_v58  ;;  %1184 = vmatprep.subr.mxu0 %v1650_v55  ;;  %v369_v62 = vadd.f32 %v1626_v26, %v346_v54 }
  0xad   :  { %1185 = vmatpush3.msra.mxu0 %v1650_v55 }
  0xae   :  { %v345_v63 = vadd.f32 %v329_v59, %v229_v60  ;;  %v1657_v0 = vmax.f32 %v369_v62, 0.0 }
  0xaf   :  { %v283_v2 = vpop.permute.xlu1 %282  ;;  %v183_v3 = vpop.permute.xlu0 %182 }
  0xb0   :  { %v328_v4 = vmul.f32 %v1617_v21, %v283_v2  ;;  %v228_v8 = vmul.f32 %v1615_v12, %v183_v3  ;;  %1186 = vmatprep.subr.mxu0 %v1657_v0  ;;  %v368_v9 = vadd.f32 %v1626_v26, %v345_v63 }
  0xb1   :  { %1187 = vmatpush3.msra.mxu0 %v1657_v0 }
  0xb2   :  { %v344_v10 = vadd.f32 %v328_v4, %v228_v8  ;;  %v1664_v14 = vmax.f32 %v368_v9, 0.0 }
  0xb3   :  { %v278_v15 = vpop.permute.xlu1 %277  ;;  %v178_v17 = vpop.permute.xlu0 %177 }
  0xb4   :  { %v327_v18 = vmul.f32 %v1617_v21, %v278_v15  ;;  %v227_v19 = vmul.f32 %v1615_v12, %v178_v17  ;;  %1188 = vmatprep.subr.mxu0 %v1664_v14  ;;  %v367_v20 = vadd.f32 %v1626_v26, %v344_v10 }
  0xb5   :  { %1189 = vmatpush3.msra.mxu0 %v1664_v14 }
  0xb6   :  { %v343_v13 = vadd.f32 %v327_v18, %v227_v19  ;;  %v1671_v22 = vmax.f32 %v367_v20, 0.0 }
  0xb7   :  { %v273_v23 = vpop.permute.xlu1 %272  ;;  %v173_v24 = vpop.permute.xlu0 %172 }
  0xb8   :  { %v326_v25 = vmul.f32 %v1617_v21, %v273_v23  ;;  %v226_v6 = vmul.f32 %v1615_v12, %v173_v24  ;;  %1190 = vmatprep.subr.mxu0 %v1671_v22  ;;  %v366_v27 = vadd.f32 %v1626_v26, %v343_v13 }
  0xb9   :  { %1191 = vmatpush3.msra.mxu0 %v1671_v22 }
  0xba   :  { %v342_v7 = vadd.f32 %v326_v25, %v226_v6  ;;  %v1678_v28 = vmax.f32 %v366_v27, 0.0 }
  0xbb   :  { %v268_v29 = vpop.permute.xlu1 %267  ;;  %v168_v30 = vpop.permute.xlu0 %167 }
  0xbc   :  { %v325_v31 = vmul.f32 %v1617_v21, %v268_v29  ;;  %v225_v32 = vmul.f32 %v1615_v12, %v168_v30  ;;  %1192 = vmatprep.subr.mxu0 %v1678_v28  ;;  %v365_v33 = vadd.f32 %v1626_v26, %v342_v7 }
  0xbd   :  { %1193 = vmatpush3.msra.mxu0 %v1678_v28 }
  0xbe   :  { %v341_v34 = vadd.f32 %v325_v31, %v225_v32  ;;  %v1685_v36 = vmax.f32 %v365_v33, 0.0 }
  0xbf   :  { %v263_v38 = vpop.permute.xlu1 %262  ;;  %v163_v39 = vpop.permute.xlu0 %162 }
  0xc0   :  { %v324_v40 = vmul.f32 %v1617_v21, %v263_v38  ;;  %v224_v43 = vmul.f32 %v1615_v12, %v163_v39  ;;  %1194 = vmatprep.subr.mxu0 %v1685_v36  ;;  %v364_v44 = vadd.f32 %v1626_v26, %v341_v34 }
  0xc1   :  { %1195 = vmatpush3.msra.mxu0 %v1685_v36 }
  0xc2   :  { %v340_v47 = vadd.f32 %v324_v40, %v224_v43  ;;  %v1692_v48 = vmax.f32 %v364_v44, 0.0  ;;  %v1731_v43 = vld [vmem:[%s2152_s0 + $0x8] sm:$0xff] }
  0xc3   :  { %v258_v50 = vpop.permute.xlu1 %257  ;;  %v158_v51 = vpop.permute.xlu0 %157  ;;  %v1755_v44 = vld [vmem:[%s2152_s0 + $0x28] sm:$0xff] }
  0xc4   :  { %v323_v52 = vmul.f32 %v1617_v21, %v258_v50  ;;  %v223_v54 = vmul.f32 %v1615_v12, %v158_v51  ;;  %1196 = vmatprep.subr.mxu0 %v1692_v48  ;;  %v363_v56 = vadd.f32 %v1626_v26, %v340_v47  ;;  %v1760_v47 = vld [vmem:[%s2152_s0 + $0x30] sm:$0xff]  ;;  %v1767_v50 = vld [vmem:[%s2152_s0 + $0x38] sm:$0xff]  ;;  %v1772_v51 = vld [vmem:[%s2152_s0 + $0x40] sm:$0xff] }
  0xc5   :  { %1197 = vmatpush3.msra.mxu0 %v1692_v48 }
  0xc6   :  { %v339_v58 = vadd.f32 %v323_v52, %v223_v54  ;;  %v1699_v59 = vmax.f32 %v363_v56, 0.0  ;;  %v1779_v52 = vld [vmem:[%s2152_s0 + $0x48] sm:$0xff]  ;;  %v1784_v54 = vld [vmem:[%s2152_s0 + $0x50] sm:$0xff]  ;;  %v1791_v56 = vld [vmem:[%s2152_s0 + $0x58] sm:$0xff] }
  0xc7   :  { %v253_v60 = vpop.permute.xlu1 %252  ;;  %v153_v62 = vpop.permute.xlu0 %152 }
  0xc8   :  { %v322_v63 = vmul.f32 %v1617_v21, %v253_v60  ;;  %v222_v2 = vmul.f32 %v1615_v12, %v153_v62  ;;  %1198 = vmatprep.subr.mxu0 %v1699_v59  ;;  %v362_v3 = vadd.f32 %v1626_v26, %v339_v58  ;;  %v1796_v58 = vld [vmem:[%s2152_s0 + $0x60] sm:$0xff]  ;;  %v1803_v60 = vld [vmem:[%s2152_s0 + $0x68] sm:$0xff]  ;;  %v1808_v62 = vld [vmem:[%s2152_s0 + $0x70] sm:$0xff] }
  0xc9   :  { %1199 = vmatpush3.msra.mxu0 %v1699_v59 }
  0xca   :  { %v338_v4 = vadd.f32 %v322_v63, %v222_v2  ;;  %v1706_v8 = vmax.f32 %v362_v3, 0.0  ;;  %v1815_v63 = vld [vmem:[%s2152_s0 + $0x78] sm:$0xff]  ;;  %v573_v3 = vld [vmem:[%s2155_s7 + $0x10] sm:$0xff] }
  0xcb   :  { %v248_v9 = vpop.permute.xlu1 %247  ;;  %v148_v10 = vpop.permute.xlu0 %147  ;;  %v574_v2 = vld [vmem:[%s2155_s7 + $0x18] sm:$0xff] }
  0xcc   :  { %v321_v15 = vmul.f32 %v1617_v21, %v248_v9  ;;  %v221_v17 = vmul.f32 %v1615_v12, %v148_v10  ;;  %1200 = vmatprep.subr.mxu0 %v1706_v8  ;;  %v361_v18 = vadd.f32 %v1626_v26, %v338_v4  ;;  %1234 = vmatprep.subr.mxu1 %v574_v2  ;;  %v572_v4 = vld [vmem:[%s2155_s7 + $0x8] sm:$0xff]  ;;  %v18_v9 = vstv %s2156_s8 }
  0xcd   :  { %1201 = vmatpush3.msra.mxu0 %v1706_v8  ;;  %1235 = vmatpush3.msra.mxu1 %v574_v2  ;;  %19 = vst [vmem:[#allocation4] sm:$0x1] %v18_v9 }
  0xce   :  { %v337_v19 = vadd.f32 %v321_v15, %v221_v17  ;;  %v1713_v20 = vmax.f32 %v361_v18, 0.0  ;;  %1236 = vmatprep.subr.mxu1 %v573_v3 }
  0xcf   :  { %v243_v13 = vpop.permute.xlu1 %242  ;;  %v143_v23 = vpop.permute.xlu0 %142  ;;  %1237 = vmatpush3.msra.mxu1 %v573_v3 }
  0xd0   :  { %v320_v24 = vmul.f32 %v1617_v21, %v243_v13  ;;  %v220_v25 = vmul.f32 %v1615_v12, %v143_v23  ;;  %1202 = vmatprep.subr.mxu0 %v1713_v20  ;;  %v360_v6 = vadd.f32 %v1626_v26, %v337_v19  ;;  %1238 = vmatprep.subr.mxu1 %v572_v4 }
  0xd1   :  { %1203 = vmatpush3.msra.mxu0 %v1713_v20  ;;  %1239 = vmatpush3.msra.mxu1 %v572_v4 }
  0xd2   :  { %v336_v27 = vadd.f32 %v320_v24, %v220_v25  ;;  %v1720_v7 = vmax.f32 %v360_v6, 0.0 }
  0xd3   :  { %v238_v29 = vpop.permute.xlu1 %237  ;;  %v138_v30 = vpop.permute.xlu0 %137 }
  0xd4   :  { %v319_v31 = vmul.f32 %v1617_v21, %v238_v29  ;;  %v219_v32 = vmul.f32 %v1615_v12, %v138_v30  ;;  %1204 = vmatprep.subr.mxu0 %v1720_v7  ;;  %v359_v33 = vadd.f32 %v1626_v26, %v336_v27  ;;  %v1736_v12 = vld [vmem:[%s2152_s0 + $0x10] sm:$0xff]  ;;  %v1743_v21 = vld [vmem:[%s2152_s0 + $0x18] sm:$0xff] }
  0xd5   :  { %1205 = vmatpush3.msra.mxu0 %v1720_v7 }
  0xd6   :  { %v335_v34 = vadd.f32 %v319_v31, %v219_v32  ;;  %v375_v38 = vmax.f32 %v359_v33, 0.0 }
  0xd7   :  { %v537_v15 = vpop.permute.xlu0 %536 }
  0xd8   :  { %1206 = vmatprep.subr.mxu0 %v375_v38  ;;  %v358_v39 = vadd.f32 %v1626_v26, %v335_v34  ;;  %v1748_v26 = vld [vmem:[%s2152_s0 + $0x20] sm:$0xff] }
  0xd9   :  { %1207 = vmatpush3.msra.mxu0 %v375_v38 }
  0xda   :  { %v374_v40 = vmax.f32 %v358_v39, 0.0 }
  0xdc   :  { %1208 = vmatprep.subr.mxu0 %v374_v40 }
  0xdd   :  { %1209 = vmatpush3.msra.mxu0 %v374_v40 }
  0xde   :  { %1211 = vmatmul.mubr.f32.vlgmr.msra.gmra.mxu0 %v1731_v43 }
  0xdf   :  { %1213 = vmatprep.mubr.f32.mxu0 %v1736_v12 }
  0xe2   :  { %1214 = vmatmul.mubr.f32.gmra.mxu0 %v1743_v21 }
  0xe3   :  { %1216 = vmatprep.mubr.f32.mxu0 %v1748_v26 }
  0xe6   :  { %1217 = vmatmul.mubr.f32.gmra.mxu0 %v1755_v44 }
  0xe7   :  { %1219 = vmatprep.mubr.f32.mxu0 %v1760_v47 }
  0xea   :  { %1220 = vmatmul.mubr.f32.gmra.mxu0 %v1767_v50 }
  0xeb   :  { %1222 = vmatprep.mubr.f32.mxu0 %v1772_v51 }
  0xee   :  { %1223 = vmatmul.mubr.f32.gmra.mxu0 %v1779_v52 }
  0xef   :  { %1225 = vmatprep.mubr.f32.mxu0 %v1784_v54 }
  0xf2   :  { %1226 = vmatmul.mubr.f32.gmra.mxu0 %v1791_v56 }
  0xf3   :  { %1228 = vmatprep.mubr.f32.mxu0 %v1796_v58 }
  0xf6   :  { %1229 = vmatmul.mubr.f32.gmra.mxu0 %v1803_v60 }
  0xf7   :  { %1231 = vmatprep.mubr.f32.mxu0 %v1808_v62 }
  0xfa   :  { %1232 = vmatmul.mubr.f32.gmra.mxu0 %v1815_v63 }
  0xfb   :  { %1298 = vmatprep.mubr.f32.mxu0 %v1607_v16  ;;  %v571_v16 = vld [vmem:[%s2155_s7] sm:$0xff] }
  0xfc   :  { %1240 = vmatprep.subr.mxu1 %v571_v16 }
  0xfd   :  { %1241 = vmatpush3.msra.mxu1 %v571_v16 }
 0x19e   :  { %v1212_v10 = vpop.f32.mrf.mxu0 }
 0x19f   :  { %v540_v17 = vmul.f32 %v1212_v10, %v537_v15 }
 0x1a0   :  { %v456_v18 = vpop.f32.mrf.mxu0 }
 0x1a1   :  { %v539_v19 = vmul.f32 %v537_v15, %v456_v18  ;;  %v556_v24 = vadd.f32 %v540_v17, %v375_v38 }
 0x1a2   :  { %v1215_v13 = vpop.f32.mrf.mxu0 }
 0x1a3   :  { %v555_v23 = vadd.f32 %v539_v19, %v374_v40  ;;  %v542_v25 = vmul.f32 %v1215_v13, %v537_v15 }
 0x1a4   :  { %v466_v6 = vpop.f32.mrf.mxu0 }
 0x1a5   :  { %v541_v27 = vmul.f32 %v537_v15, %v466_v6  ;;  %1242 = vmatprep.mubr.msk.f32.mxu1 %vm582_vm0, %v555_v23  ;;  %v558_v31 = vadd.f32 %v542_v25, %v1713_v20 }
 0x1a6   :  { %v1218_v29 = vpop.f32.mrf.mxu0  ;;  %1243 = vmatmul.mubr.msk.f32.vlgmr.msra.gmra.mxu1 %vm582_vm0, %v556_v24 }
 0x1a7   :  { %v557_v30 = vadd.f32 %v541_v27, %v1720_v7  ;;  %v544_v32 = vmul.f32 %v1218_v29, %v537_v15 }
 0x1a8   :  { %v476_v33 = vpop.f32.mrf.mxu0 }
 0x1a9   :  { %v543_v34 = vmul.f32 %v537_v15, %v476_v33  ;;  %1245 = vmatprep.mubr.msk.f32.mxu1 %vm582_vm0, %v557_v30  ;;  %v560_v40 = vadd.f32 %v544_v32, %v1699_v59 }
 0x1aa   :  { %v1221_v39 = vpop.f32.mrf.mxu0  ;;  %1246 = vmatmul.mubr.msk.f32.gmra.mxu1 %vm582_vm0, %v558_v31 }
 0x1ab   :  { %v559_v38 = vadd.f32 %v543_v34, %v1706_v8  ;;  %v546_v2 = vmul.f32 %v1221_v39, %v537_v15 }
 0x1ac   :  { %v486_v3 = vpop.f32.mrf.mxu0 }
 0x1ad   :  { %v545_v4 = vmul.f32 %v537_v15, %v486_v3  ;;  %1248 = vmatprep.mubr.msk.f32.mxu1 %vm582_vm0, %v559_v38  ;;  %v562_v16 = vadd.f32 %v546_v2, %v1685_v36 }
 0x1ae   :  { %v1224_v7 = vpop.f32.mrf.mxu0  ;;  %1249 = vmatmul.mubr.msk.f32.gmra.mxu1 %vm582_vm0, %v560_v40 }
 0x1af   :  { %v561_v20 = vadd.f32 %v545_v4, %v1692_v48  ;;  %v548_v9 = vmul.f32 %v1224_v7, %v537_v15 }
 0x1b0   :  { %v496_v10 = vpop.f32.mrf.mxu0 }
 0x1b1   :  { %v547_v17 = vmul.f32 %v537_v15, %v496_v10  ;;  %1251 = vmatprep.mubr.msk.f32.mxu1 %vm582_vm0, %v561_v20  ;;  %v564_v18 = vadd.f32 %v548_v9, %v1671_v22 }
 0x1b2   :  { %v1227_v8 = vpop.f32.mrf.mxu0  ;;  %1252 = vmatmul.mubr.msk.f32.gmra.mxu1 %vm582_vm0, %v562_v16 }
 0x1b3   :  { %v563_v59 = vadd.f32 %v547_v17, %v1678_v28  ;;  %v550_v19 = vmul.f32 %v1227_v8, %v537_v15 }
 0x1b4   :  { %v506_v13 = vpop.f32.mrf.mxu0 }
 0x1b5   :  { %v549_v23 = vmul.f32 %v537_v15, %v506_v13  ;;  %1254 = vmatprep.mubr.msk.f32.mxu1 %vm582_vm0, %v563_v59  ;;  %v566_v24 = vadd.f32 %v550_v19, %v1657_v0 }
 0x1b6   :  { %v1230_v48 = vpop.f32.mrf.mxu0  ;;  %1255 = vmatmul.mubr.msk.f32.gmra.mxu1 %vm582_vm0, %v564_v18 }
 0x1b7   :  { %v565_v36 = vadd.f32 %v549_v23, %v1664_v14  ;;  %v552_v25 = vmul.f32 %v1230_v48, %v537_v15 }
 0x1b8   :  { %v516_v6 = vpop.f32.mrf.mxu0 }
 0x1b9   :  { %v551_v27 = vmul.f32 %v537_v15, %v516_v6  ;;  %1257 = vmatprep.mubr.msk.f32.mxu1 %vm582_vm0, %v565_v36  ;;  %v568_v29 = vadd.f32 %v552_v25, %v1642_v46 }
 0x1ba   :  { %v1233_v28 = vpop.f32.mrf.mxu0  ;;  %1258 = vmatmul.mubr.msk.f32.gmra.mxu1 %vm582_vm0, %v566_v24 }
 0x1bb   :  { %v567_v22 = vadd.f32 %v551_v27, %v1650_v55  ;;  %v554_v30 = vmul.f32 %v1233_v28, %v537_v15 }
 0x1bc   :  { %v526_v31 = vpop.f32.mrf.mxu0 }
 0x1bd   :  { %v553_v32 = vmul.f32 %v537_v15, %v526_v31  ;;  %1260 = vmatprep.mubr.msk.f32.mxu1 %vm582_vm0, %v567_v22  ;;  %v570_v14 = vadd.f32 %v554_v30, %v1632_v35 }
 0x1be   :  { %1261 = vmatmul.mubr.msk.f32.gmra.mxu1 %vm582_vm0, %v568_v29 }
 0x1bf   :  { %v569_v0 = vadd.f32 %v553_v32, %v1637_v42 }
 0x1c1   :  { %1263 = vmatprep.mubr.msk.f32.mxu1 %vm582_vm0, %v569_v0 }
 0x1c2   :  { %1264 = vmatmul.mubr.msk.f32.gmra.mxu1 %vm582_vm0, %v570_v14 }
 0x1c3   :  { %1301 = vmatprep.mubr.f32.mxu1 %v1736_v12  ;;  %v1875_v12 = vld [vmem:[#allocation4] ss:$0 sm:$0xff] }
 0x266   :  { %v1865_v55 = vpop.f32.mrf.mxu1 }
 0x267   :  { %v1976_v27 = vadd.f32 %v1865_v55, %v1875_v12 }
 0x268   :  { %v1867_v46 = vpop.f32.mrf.mxu1 }
 0x269   :  { %v1984_v28 = vadd.f32 %v1875_v12, %v1867_v46 }
 0x26a   :  { %v1869_v33 = vpop.f32.mrf.mxu1 }
 0x26b   :  { %v1960_v25 = vadd.f32 %v1869_v33, %v1875_v12 }
 0x26c   :  { %v1871_v15 = vpop.f32.mrf.mxu1 }
 0x26d   :  { %v1968_v6 = vadd.f32 %v1875_v12, %v1871_v15 }
 0x26e   :  { %v1250_v34 = vpop.f32.mrf.mxu1 }
 0x26f   :  { %v1944_v36 = vadd.f32 %v1250_v34, %v1875_v12 }
 0x270   :  { %v1873_v39 = vpop.f32.mrf.mxu1 }
 0x271   :  { %v1952_v24 = vadd.f32 %v1875_v12, %v1873_v39 }
 0x272   :  { %v1253_v42 = vpop.f32.mrf.mxu1 }
 0x273   :  { %v1930_v23 = vadd.f32 %v1253_v42, %v1875_v12 }
 0x274   :  { %v727_v38 = vpop.f32.mrf.mxu1 }
 0x275   :  { %v1937_v48 = vadd.f32 %v1875_v12, %v727_v38 }
 0x276   :  { %v1256_v35 = vpop.f32.mrf.mxu1 }
 0x277   :  { %v1916_v19 = vadd.f32 %v1256_v35, %v1875_v12 }
 0x278   :  { %v737_v40 = vpop.f32.mrf.mxu1 }
 0x279   :  { %v1923_v13 = vadd.f32 %v1875_v12, %v737_v40 }
 0x27a   :  { %v1259_v2 = vpop.f32.mrf.mxu1 }
 0x27b   :  { %v1902_v59 = vadd.f32 %v1259_v2, %v1875_v12 }
 0x27c   :  { %v747_v3 = vpop.f32.mrf.mxu1 }
 0x27d   :  { %v1909_v18 = vadd.f32 %v1875_v12, %v747_v3 }
 0x27e   :  { %v1262_v4 = vpop.f32.mrf.mxu1 }
 0x27f   :  { %v1888_v17 = vadd.f32 %v1262_v4, %v1875_v12 }
 0x280   :  { %v757_v7 = vpop.f32.mrf.mxu1 }
 0x281   :  { %v1895_v8 = vadd.f32 %v1875_v12, %v757_v7 }
 0x282   :  { %v1265_v20 = vpop.f32.mrf.mxu1 }
 0x283   :  { %v1878_v16 = vadd.f32 %v1265_v20, %v1875_v12 }
 0x284   :  { %v767_v9 = vpop.f32.mrf.mxu1 }
 0x285   :  { %v1881_v10 = vadd.f32 %v1875_v12, %v767_v9  ;;  %1266 = vmatprep.subr.mxu0 %v1878_v16  ;;  %1322 = vmatprep.subr.mxu1 %v1878_v16 }
 0x286   :  { %1267 = vmatpush3.msra.mxu0 %v1878_v16  ;;  %1338 = vmatpush3.msra.mxu1 %v1878_v16 }
 0x287   :  { %1268 = vmatprep.subr.mxu0 %v1881_v10  ;;  %1323 = vmatprep.subr.mxu1 %v1881_v10 }
 0x288   :  { %1269 = vmatpush3.msra.mxu0 %v1881_v10  ;;  %1339 = vmatpush3.msra.mxu1 %v1881_v10 }
 0x289   :  { %1270 = vmatprep.subr.mxu0 %v1888_v17  ;;  %1324 = vmatprep.subr.mxu1 %v1888_v17 }
 0x28a   :  { %1271 = vmatpush3.msra.mxu0 %v1888_v17  ;;  %1340 = vmatpush3.msra.mxu1 %v1888_v17 }
 0x28b   :  { %1272 = vmatprep.subr.mxu0 %v1895_v8  ;;  %1325 = vmatprep.subr.mxu1 %v1895_v8 }
 0x28c   :  { %1273 = vmatpush3.msra.mxu0 %v1895_v8  ;;  %1341 = vmatpush3.msra.mxu1 %v1895_v8 }
 0x28d   :  { %1274 = vmatprep.subr.mxu0 %v1902_v59  ;;  %1326 = vmatprep.subr.mxu1 %v1902_v59 }
 0x28e   :  { %1275 = vmatpush3.msra.mxu0 %v1902_v59  ;;  %1342 = vmatpush3.msra.mxu1 %v1902_v59 }
 0x28f   :  { %1276 = vmatprep.subr.mxu0 %v1909_v18  ;;  %1327 = vmatprep.subr.mxu1 %v1909_v18 }
 0x290   :  { %1277 = vmatpush3.msra.mxu0 %v1909_v18  ;;  %1343 = vmatpush3.msra.mxu1 %v1909_v18 }
 0x291   :  { %1278 = vmatprep.subr.mxu0 %v1916_v19  ;;  %1328 = vmatprep.subr.mxu1 %v1916_v19 }
 0x292   :  { %1279 = vmatpush3.msra.mxu0 %v1916_v19  ;;  %1344 = vmatpush3.msra.mxu1 %v1916_v19 }
 0x293   :  { %1280 = vmatprep.subr.mxu0 %v1923_v13  ;;  %1329 = vmatprep.subr.mxu1 %v1923_v13 }
 0x294   :  { %1281 = vmatpush3.msra.mxu0 %v1923_v13  ;;  %1345 = vmatpush3.msra.mxu1 %v1923_v13 }
 0x295   :  { %1282 = vmatprep.subr.mxu0 %v1930_v23  ;;  %1330 = vmatprep.subr.mxu1 %v1930_v23 }
 0x296   :  { %1283 = vmatpush3.msra.mxu0 %v1930_v23  ;;  %1346 = vmatpush3.msra.mxu1 %v1930_v23 }
 0x297   :  { %1284 = vmatprep.subr.mxu0 %v1937_v48  ;;  %1331 = vmatprep.subr.mxu1 %v1937_v48 }
 0x298   :  { %1285 = vmatpush3.msra.mxu0 %v1937_v48  ;;  %1347 = vmatpush3.msra.mxu1 %v1937_v48 }
 0x299   :  { %1286 = vmatprep.subr.mxu0 %v1944_v36  ;;  %1332 = vmatprep.subr.mxu1 %v1944_v36 }
 0x29a   :  { %1287 = vmatpush3.msra.mxu0 %v1944_v36  ;;  %1348 = vmatpush3.msra.mxu1 %v1944_v36 }
 0x29b   :  { %1288 = vmatprep.subr.mxu0 %v1952_v24  ;;  %1333 = vmatprep.subr.mxu1 %v1952_v24 }
 0x29c   :  { %1289 = vmatpush3.msra.mxu0 %v1952_v24  ;;  %1349 = vmatpush3.msra.mxu1 %v1952_v24 }
 0x29d   :  { %1290 = vmatprep.subr.mxu0 %v1960_v25  ;;  %1334 = vmatprep.subr.mxu1 %v1960_v25 }
 0x29e   :  { %1291 = vmatpush3.msra.mxu0 %v1960_v25  ;;  %1350 = vmatpush3.msra.mxu1 %v1960_v25 }
 0x29f   :  { %1292 = vmatprep.subr.mxu0 %v1968_v6  ;;  %1335 = vmatprep.subr.mxu1 %v1968_v6 }
 0x2a0   :  { %1293 = vmatpush3.msra.mxu0 %v1968_v6  ;;  %1351 = vmatpush3.msra.mxu1 %v1968_v6 }
 0x2a1   :  { %1294 = vmatprep.subr.mxu0 %v1976_v27  ;;  %1336 = vmatprep.subr.mxu1 %v1976_v27 }
 0x2a2   :  { %1295 = vmatpush3.msra.mxu0 %v1976_v27  ;;  %1352 = vmatpush3.msra.mxu1 %v1976_v27 }
 0x2a3   :  { %1296 = vmatprep.subr.mxu0 %v1984_v28  ;;  %1337 = vmatprep.subr.mxu1 %v1984_v28 }
 0x2a4   :  { %1297 = vmatpush3.msra.mxu0 %v1984_v28  ;;  %1353 = vmatpush3.msra.mxu1 %v1984_v28 }
 0x2a5   :  { %1299 = vmatmul.mubr.f32.vlgmr.msra.gmra.mxu0 %v1731_v43  ;;  %1302 = vmatmul.mubr.f32.vlgmr.msra.gmra.mxu1 %v1743_v21 }
 0x2a6   :  { %1304 = vmatprep.mubr.f32.mxu1 %v1748_v26 }
 0x2a9   :  { %1305 = vmatmul.mubr.f32.gmra.mxu1 %v1755_v44 }
 0x2aa   :  { %1307 = vmatprep.mubr.f32.mxu1 %v1760_v47 }
 0x2ad   :  { %1308 = vmatmul.mubr.f32.gmra.mxu1 %v1767_v50 }
 0x2ae   :  { %1310 = vmatprep.mubr.f32.mxu1 %v1772_v51 }
 0x2b1   :  { %1311 = vmatmul.mubr.f32.gmra.mxu1 %v1779_v52 }
 0x2b2   :  { %1313 = vmatprep.mubr.f32.mxu1 %v1784_v54 }
 0x2b5   :  { %1314 = vmatmul.mubr.f32.gmra.mxu1 %v1791_v56 }
 0x2b6   :  { %1316 = vmatprep.mubr.f32.mxu1 %v1796_v58 }
 0x2b9   :  { %1317 = vmatmul.mubr.f32.gmra.mxu1 %v1803_v60 }
 0x2ba   :  { %1319 = vmatprep.mubr.f32.mxu1 %v1808_v62 }
 0x2bd   :  { %1320 = vmatmul.mubr.f32.gmra.mxu1 %v1815_v63 }
 0x365   :  { %v1300_v43 = vpop.f32.mrf.mxu0  ;;  %v1303_v21 = vpop.f32.mrf.mxu1 }
 0x366   :  { %v922_v26 = vmul.f32 %v1300_v43, %v1300_v43  ;;  %v979_v44 = vmul.f32 %v1300_v43, %v1587_v5  ;;  %v924_v60 = vmul.f32 %v1303_v21, %v1303_v21  ;;  %v981_v62 = vmul.f32 %v1303_v21, %v1565_v61 }
 0x367   :  { %v842_v47 = vpop.f32.mrf.mxu0  ;;  %v852_v50 = vpop.f32.mrf.mxu1 }
 0x368   :  { %v921_v51 = vmul.f32 %v842_v47, %v842_v47  ;;  %v978_v52 = vmul.f32 %v842_v47, %v1598_v11  ;;  %v923_v54 = vmul.f32 %v852_v50, %v852_v50  ;;  %v980_v56 = vmul.f32 %v852_v50, %v1576_v1 }
 0x369   :  { %v1306_v58 = vpop.f32.mrf.mxu1  ;;  %v939_v63 = vsel %vm937_vm1, %v922_v26, 0.0  ;;  %v995_v22 = vsel %vm937_vm1, %v979_v44, 0.0  ;;  %v943_v33 = vsel %vm937_vm1, %v924_v60, 0.0  ;;  %v999_v15 = vsel %vm937_vm1, %v981_v62, 0.0 }
 0x36a   :  { %v938_v29 = vsel %vm937_vm1, %v921_v51, 0.0  ;;  %v994_v5 = vsel %vm937_vm1, %v978_v52, 0.0  ;;  %v941_v11 = vsel %vm937_vm1, %v923_v54, 0.0  ;;  %v997_v0 = vsel %vm937_vm1, %v980_v56, 0.0 }
 0x36b   :  { %v862_v30 = vpop.f32.mrf.mxu1  ;;  %v940_v31 = vadd.f32 %v939_v63, %v938_v29  ;;  %v996_v32 = vadd.f32 %v995_v22, %v994_v5  ;;  %v926_v34 = vmul.f32 %v1306_v58, %v1306_v58  ;;  %v983_v39 = vmul.f32 %v1306_v58, %v1543_v53 }
 0x36c   :  { %v925_v1 = vmul.f32 %v862_v30, %v862_v30  ;;  %v982_v14 = vmul.f32 %v862_v30, %v1554_v57 }
 0x36d   :  { %v1309_v55 = vpop.f32.mrf.mxu1  ;;  %v942_v61 = vadd.f32 %v941_v11, %v940_v31  ;;  %v998_v46 = vadd.f32 %v997_v0, %v996_v32  ;;  %v947_v20 = vsel %vm937_vm1, %v926_v34, 0.0  ;;  %v1003_v9 = vsel %vm937_vm1, %v983_v39, 0.0 }
 0x36e   :  { %v945_v40 = vsel %vm937_vm1, %v925_v1, 0.0  ;;  %v1001_v2 = vsel %vm937_vm1, %v982_v14, 0.0  ;;  %v928_v43 = vmul.f32 %v1309_v55, %v1309_v55  ;;  %v985_v53 = vmul.f32 %v1309_v55, %v1521_v45 }
 0x36f   :  { %v872_v42 = vpop.f32.mrf.mxu1  ;;  %v944_v38 = vadd.f32 %v943_v33, %v942_v61  ;;  %v1000_v35 = vadd.f32 %v999_v15, %v998_v46  ;;  %v1371_v61 = vld [vmem:[%s2150_s1 + $0x58] sm:$0xff] }
 0x370   :  { %v927_v3 = vmul.f32 %v872_v42, %v872_v42  ;;  %v984_v57 = vmul.f32 %v872_v42, %v1532_v49  ;;  %v951_v58 = vsel %vm937_vm1, %v928_v43, 0.0  ;;  %v1007_v60 = vsel %vm937_vm1, %v985_v53, 0.0 }
 0x371   :  { %v1312_v4 = vpop.f32.mrf.mxu1  ;;  %v946_v7 = vadd.f32 %v945_v40, %v944_v38  ;;  %v1002_v12 = vadd.f32 %v1001_v2, %v1000_v35  ;;  %v1372_v35 = vld [vmem:[%s2150_s1 + $0x60] sm:$0xff] }
 0x372   :  { %v949_v47 = vsel %vm937_vm1, %v927_v3, 0.0  ;;  %v1005_v50 = vsel %vm937_vm1, %v984_v57, 0.0  ;;  %v930_v62 = vmul.f32 %v1312_v4, %v1312_v4  ;;  %v987_v45 = vmul.f32 %v1312_v4, %v1499_v37 }
 0x373   :  { %v882_v21 = vpop.f32.mrf.mxu1  ;;  %v948_v26 = vadd.f32 %v947_v20, %v946_v7  ;;  %v1004_v44 = vadd.f32 %v1003_v9, %v1002_v12  ;;  %v1373_v20 = vld [vmem:[%s2150_s1 + $0x68] sm:$0xff] }
 0x374   :  { %v929_v51 = vmul.f32 %v882_v21, %v882_v21  ;;  %v986_v49 = vmul.f32 %v882_v21, %v1510_v41  ;;  %v1370_v41 = vld [vmem:[%s2150_s1 + $0x50] sm:$0xff]  ;;  %v955_v14 = vsel %vm937_vm1, %v930_v62, 0.0  ;;  %v1011_v37 = vsel %vm937_vm1, %v987_v45, 0.0 }
 0x375   :  { %v1315_v52 = vpop.f32.mrf.mxu1  ;;  %v950_v54 = vadd.f32 %v949_v47, %v948_v26  ;;  %v1006_v56 = vadd.f32 %v1005_v50, %v1004_v44  ;;  %v1374_v50 = vld [vmem:[%s2150_s1 + $0x70] sm:$0xff] }
 0x376   :  { %v953_v5 = vsel %vm937_vm1, %v929_v51, 0.0  ;;  %v1009_v30 = vsel %vm937_vm1, %v986_v49, 0.0  ;;  %v932_v55 = vmul.f32 %v1315_v52, %v1315_v52  ;;  %v989_v46 = vmul.f32 %v1371_v61, %v1315_v52 }
 0x377   :  { %v892_v63 = vpop.f32.mrf.mxu1  ;;  %v952_v22 = vadd.f32 %v951_v58, %v950_v54  ;;  %v1008_v29 = vadd.f32 %v1007_v60, %v1006_v56  ;;  %v1375_v60 = vld [vmem:[%s2150_s1 + $0x78] sm:$0xff] }
 0x378   :  { %v931_v31 = vmul.f32 %v892_v63, %v892_v63  ;;  %v988_v32 = vmul.f32 %v1370_v41, %v892_v63  ;;  %v959_v4 = vsel %vm937_vm1, %v932_v55, 0.0  ;;  %v1015_v7 = vsel %vm937_vm1, %v989_v46, 0.0 }
 0x379   :  { %v1318_v11 = vpop.f32.mrf.mxu1  ;;  %v954_v0 = vadd.f32 %v953_v5, %v952_v22  ;;  %v1010_v1 = vadd.f32 %v1009_v30, %v1008_v29 }
 0x37a   :  { %v957_v39 = vsel %vm937_vm1, %v931_v31, 0.0  ;;  %v1013_v42 = vsel %vm937_vm1, %v988_v32, 0.0  ;;  %v934_v12 = vmul.f32 %v1318_v11, %v1318_v11  ;;  %v991_v9 = vmul.f32 %v1373_v20, %v1318_v11 }
 0x37b   :  { %v902_v33 = vpop.f32.mrf.mxu1  ;;  %v956_v15 = vadd.f32 %v955_v14, %v954_v0  ;;  %v1012_v34 = vadd.f32 %v1011_v37, %v1010_v1 }
 0x37c   :  { %v933_v38 = vmul.f32 %v902_v33, %v902_v33  ;;  %v990_v40 = vmul.f32 %v1372_v35, %v902_v33  ;;  %v963_v54 = vsel %vm937_vm1, %v934_v12, 0.0  ;;  %v1019_v56 = vsel %vm937_vm1, %v991_v9, 0.0 }
 0x37d   :  { %v1321_v2 = vpop.f32.mrf.mxu1  ;;  %v958_v3 = vadd.f32 %v957_v39, %v956_v15  ;;  %v1014_v57 = vadd.f32 %v1013_v42, %v1012_v34 }
 0x37e   :  { %v961_v26 = vsel %vm937_vm1, %v933_v38, 0.0  ;;  %v1017_v44 = vsel %vm937_vm1, %v990_v40, 0.0  ;;  %v936_v58 = vmul.f32 %v1321_v2, %v1321_v2  ;;  %v993_v62 = vmul.f32 %v1375_v60, %v1321_v2 }
 0x37f   :  { %v912_v43 = vpop.f32.mrf.mxu1  ;;  %v960_v53 = vadd.f32 %v959_v4, %v958_v3  ;;  %v1016_v21 = vadd.f32 %v1015_v7, %v1014_v57 }
 0x380   :  { %v935_v47 = vmul.f32 %v912_v43, %v912_v43  ;;  %v992_v51 = vmul.f32 %v1374_v50, %v912_v43  ;;  %v1023_v31 = vsel %vm937_vm1, %v993_v62, 0.0  ;;  %v967_v41 = vsel %vm937_vm1, %v936_v58, 0.0 }
 0x381   :  { %v962_v49 = vadd.f32 %v961_v26, %v960_v53  ;;  %v1018_v52 = vadd.f32 %v1017_v44, %v1016_v21 }
 0x382   :  { %v965_v22 = vsel %vm937_vm1, %v935_v47, 0.0  ;;  %v1021_v29 = vsel %vm937_vm1, %v992_v51, 0.0 }
 0x383   :  { %v1020_v45 = vadd.f32 %v1019_v56, %v1018_v52  ;;  %v964_v63 = vadd.f32 %v963_v54, %v962_v49 }
 0x385   :  { %v1022_v5 = vadd.f32 %v1021_v29, %v1020_v45  ;;  %v966_v30 = vadd.f32 %v965_v22, %v964_v63 }
 0x387   :  { %v1024_v32 = vadd.f32 %v1023_v31, %v1022_v5  ;;  %v968_v11 = vadd.f32 %v967_v41, %v966_v30 }
 0x389   :  { %1025 = vadd.xlane.f32.xlu0 %v1024_v32  ;;  %969 = vadd.xlane.f32.xlu1 %v968_v11 }
 0x412   :  { %v1026_v0 = vpop.xlane.xlu0 %1025  ;;  %v970_v1 = vpop.xlane.xlu1 %969 }
 0x413   :  { %v1027_v14 = vrot.slane %v1026_v0, 4  ;;  %v971_v37 = vrot.slane %v970_v1, 4 }
 0x415   :  { %v1028_v55 = vadd.f32 %v1027_v14, %v1026_v0  ;;  %v972_v61 = vadd.f32 %v971_v37, %v970_v1 }
 0x417   :  { %v1029_v46 = vrot.slane %v1028_v55, 2  ;;  %v973_v33 = vrot.slane %v972_v61, 2 }
 0x419   :  { %v1030_v15 = vadd.f32 %v1029_v46, %v1028_v55  ;;  %v974_v34 = vadd.f32 %v973_v33, %v972_v61 }
 0x41b   :  { %v975_v39 = vrot.slane %v974_v34, 1  ;;  %v1031_v42 = vrot.slane %v1030_v15, 1 }
 0x41d   :  { %v976_v38 = vadd.f32 %v975_v39, %v974_v34  ;;  %v1032_v35 = vadd.f32 %v1031_v42, %v1030_v15 }
 0x41f   :  { %1354 = vpush %v976_v38 }
 0x420   :  { %1356 = vpush %v1032_v35 }
 0x450   :  { %s1355_s1 = spop %1354 }
 0x451   :  { %v1034_v40 = vstv %s1355_s1  ;;  %s1357_s10 = spop %1356 }
 0x452   :  { %1368 = vrcp.f32 %v1034_v40 }
 0x45f   :  { %v1369_v2 = vpop.eup %1368 }
 0x460   :  { %1358 = vpush %v1369_v2 }
 0x491   :  { %s1359_s11 = spop %1358 }
 0x492   :  { %s1037_s12 = smul.f32 %s1359_s11, %s1357_s10 }
 0x494   :  { %s1038_s6 = smax.f32 %s1377_s5, %s1037_s12 }
 0x495   :  { %v1039_v3 = vstv %s1038_s6 }
 0x496   :  { %v1040_v57 = vmul.f32 %v1039_v3, %v1984_v28  ;;  %v1041_v4 = vmul.f32 %v1039_v3, %v1976_v27  ;;  %v1042_v7 = vmul.f32 %v1039_v3, %v1968_v6  ;;  %v1043_v12 = vmul.f32 %v1039_v3, %v1960_v25 }
 0x497   :  { %v1044_v20 = vmul.f32 %v1039_v3, %v1952_v24  ;;  %v1045_v9 = vmul.f32 %v1039_v3, %v1944_v36  ;;  %v1046_v43 = vmul.f32 %v1039_v3, %v1937_v48  ;;  %v1047_v53 = vmul.f32 %v1039_v3, %v1930_v23 }
 0x498   :  { %v1048_v21 = vmul.f32 %v1039_v3, %v1923_v13  ;;  %v1049_v26 = vmul.f32 %v1039_v3, %v1916_v19  ;;  %v1050_v28 = vmul.f32 %v1039_v3, %v1909_v18  ;;  %v1051_v27 = vmul.f32 %v1039_v3, %v1902_v59  ;;  %1056 = vst.msk [vmem:[%s2157_s9] sm:$0xff] %vm937_vm1, %v1040_v57 }
 0x499   :  { %1057 = vst.msk [vmem:[%s2157_s9 + $0x8] sm:$0xff] %vm937_vm1, %v1041_v4  ;;  %1058 = vst.msk [vmem:[%s2157_s9 + $0x10] sm:$0xff] %vm937_vm1, %v1042_v7  ;;  %v1052_v59 = vmul.f32 %v1039_v3, %v1895_v8  ;;  %v1053_v18 = vmul.f32 %v1039_v3, %v1888_v17  ;;  %v1054_v19 = vmul.f32 %v1039_v3, %v1881_v10 }
 0x49a   :  { %1059 = vst.msk [vmem:[%s2157_s9 + $0x18] sm:$0xff] %vm937_vm1, %v1043_v12  ;;  %v1055_v13 = vmul.f32 %v1039_v3, %v1878_v16  ;;  %1060 = vst.msk [vmem:[%s2157_s9 + $0x20] sm:$0xff] %vm937_vm1, %v1044_v20 }
 0x49b   :  { %1061 = vst.msk [vmem:[%s2157_s9 + $0x28] sm:$0xff] %vm937_vm1, %v1045_v9  ;;  %1062 = vst.msk [vmem:[%s2157_s9 + $0x30] sm:$0xff] %vm937_vm1, %v1046_v43 }
 0x49c   :  { %1063 = vst.msk [vmem:[%s2157_s9 + $0x38] sm:$0xff] %vm937_vm1, %v1047_v53  ;;  %1064 = vst.msk [vmem:[%s2157_s9 + $0x40] sm:$0xff] %vm937_vm1, %v1048_v21 }
 0x49d   :  { %1065 = vst.msk [vmem:[%s2157_s9 + $0x48] sm:$0xff] %vm937_vm1, %v1049_v26  ;;  %1066 = vst.msk [vmem:[%s2157_s9 + $0x50] sm:$0xff] %vm937_vm1, %v1050_v28 }
 0x49e   :  { %1067 = vst.msk [vmem:[%s2157_s9 + $0x58] sm:$0xff] %vm937_vm1, %v1051_v27  ;;  %1068 = vst.msk [vmem:[%s2157_s9 + $0x60] sm:$0xff] %vm937_vm1, %v1052_v59 }
 0x49f   :  { %1069 = vst.msk [vmem:[%s2157_s9 + $0x68] sm:$0xff] %vm937_vm1, %v1053_v18  ;;  %1070 = vst.msk [vmem:[%s2157_s9 + $0x70] sm:$0xff] %vm937_vm1, %v1054_v19 }
 0x4a0   :  { %1071 = vst.msk [vmem:[%s2157_s9 + $0x78] sm:$0xff] %vm937_vm1, %v1055_v13 }

</bundles_post_ra>
